<compile_context>
chip_gen: v5e
topology: v5e:2x2
jax: 0.10.0
libtpu: 0.0.40
codegen_flags: <defaults>
</compile_context>

<pallas_src>
import functools

import jax
import jax.numpy as jnp
from jax.experimental import pallas as pl
from jax.experimental.pallas import tpu as pltpu


def _rmsnorm_kernel(x_ref, w_ref, o_ref, *, eps, inv_d, low_precision_mul):
    # x_ref: (tile_rows, D) VMEM tile; w_ref: (1, D) resident weight slab.
    x = x_ref[...]
    xf = x.astype(jnp.float32)
    # sum * (1/D) instead of mean: reduce on XLU, single scalar multiply.
    ms = jnp.sum(xf * xf, axis=-1, keepdims=True) * inv_d
    inv_rms = jax.lax.rsqrt(ms + eps)  # EUP slot (keep rsqrt, no sqrt+div)
    if low_precision_mul:
        # Keep the big (tile_rows, D) multiplies in the input dtype (bf16 on
        # v6e/v7x): halves vreg traffic; reduction above stays f32.
        y = x * inv_rms.astype(x.dtype) * w_ref[...].astype(x.dtype)
    else:
        y = xf * inv_rms * w_ref[...].astype(jnp.float32)
    o_ref[...] = y.astype(o_ref.dtype)


def _round_up(n, m):
    return (n + m - 1) // m * m


def _pick_tile_rows(R, D, dtype_bytes, *, vmem_budget_bytes=48 << 20,
                    max_tile_rows=1024):
    """Largest 8-aligned row tile whose double-buffered in+out tiles fit the
    per-TensorCore VMEM budget (v7x-safe), capped at 1024 rows (past ~85% of
    HBM roofline gains plateau)."""
    weight_slab = 2 * 8 * D * 4           # double-buffered (8, D)-padded weight
    per_row = 4 * D * dtype_bytes          # 2 buffers x (input + output) rows
    budget_rows = max(8, (vmem_budget_bytes - weight_slab) // per_row)
    tile = min(budget_rows, max_tile_rows, _round_up(R, 8))
    return max(8, (tile // 8) * 8)


def rmsnorm(x, weight, eps=1e-5, *, tile_rows=None, low_precision_mul=None):
    """x: [..., D]; weight: [D]. Returns same shape/dtype as x."""
    orig_shape = x.shape
    D = orig_shape[-1]
    x2 = x.reshape(-1, D)
    R = x2.shape[0]
    dtype_bytes = jnp.dtype(x.dtype).itemsize

    if tile_rows is None:
        tile_rows = _pick_tile_rows(R, D, dtype_bytes)
    if low_precision_mul is None:
        # Auto: bf16 elementwise path on bf16 inputs (v6e/v7x have bf16 VPU).
        # On v5e this is still numerically correct; set False there if desired.
        low_precision_mul = (x.dtype == jnp.bfloat16)

    w2 = weight.reshape(1, D)
    grid = (pl.cdiv(R, tile_rows),)  # ragged last block handled by Pallas

    # Explicit scoped-VMEM limit: tiles + headroom, capped at 64 MiB so it is
    # valid on v7x (64 MiB/TC) as well as v5e/v6e (128 MiB).
    need = 4 * tile_rows * D * dtype_bytes + 2 * 8 * D * 4
    vmem_limit = int(min(max(need + need // 4, 16 << 20), 64 << 20))

    kernel = functools.partial(
        _rmsnorm_kernel,
        eps=float(eps),
        inv_d=1.0 / float(D),
        low_precision_mul=bool(low_precision_mul),
    )

    out = pl.pallas_call(
        kernel,
        out_shape=jax.ShapeDtypeStruct((R, D), x.dtype),
        grid_spec=pltpu.PrefetchScalarGridSpec(
            num_scalar_prefetch=0,
            grid=grid,
            in_specs=[
                pl.BlockSpec((tile_rows, D), lambda i: (i, 0)),
                pl.BlockSpec((1, D), lambda i: (0, 0)),  # weight stays resident
            ],
            out_specs=pl.BlockSpec((tile_rows, D), lambda i: (i, 0)),
        ),
        compiler_params=pltpu.CompilerParams(
            # "parallel" also shards the row grid across both TCs on v7x;
            # the VMEM budget above is per-core, so sizing is still correct.
            dimension_semantics=("parallel",),
            vmem_limit_bytes=vmem_limit,
        ),
    )(x2, w2)

    return out.reshape(orig_shape)


def rmsnorm_ref(x, weight, eps=1e-5):
    xf = x.astype(jnp.float32)
    rms = jnp.sqrt(jnp.mean(xf * xf, axis=-1, keepdims=True) + eps)
    return (xf / rms * weight.astype(jnp.float32)).astype(x.dtype)


if __name__ == "__main__":
    key = jax.random.PRNGKey(0)
    B, S, D = 2, 8, 32  # batch, seq, d_model (small demo shapes)
    x = jax.random.normal(key, (B, S, D), dtype=jnp.float32)
    # nn.Parameter(torch.ones(d_model)) — deterministic init
    weight = jnp.ones((D,), dtype=jnp.float32)

    out = jax.block_until_ready(rmsnorm(x, weight, eps=1e-5))
    ref = rmsnorm_ref(x, weight, eps=1e-5)
    assert out.shape == x.shape and out.dtype == x.dtype
    assert jnp.allclose(out, ref, atol=1e-5, rtol=1e-5), "mismatch vs reference"

    # Exercise the ragged-last-block path (R = 15 rows, not a tile multiple).
    x_rag = jax.random.normal(jax.random.PRNGKey(1), (3, 5, D), dtype=jnp.float32)
    out_rag = jax.block_until_ready(rmsnorm(x_rag, weight, eps=1e-5))
    assert jnp.allclose(out_rag, rmsnorm_ref(x_rag, weight, eps=1e-5),
                        atol=1e-5, rtol=1e-5), "ragged-grid mismatch"

    print("KERNEL_OK")
</pallas_src>

<mosaic_0001>
module attributes {stable_mosaic.version = 11 : i64} {
  func.func @_rmsnorm_kernel(%arg0: i32, %arg1: memref<16x32xf32, #tpu.memory_space<vmem>>, %arg2: memref<1x32xf32, #tpu.memory_space<vmem>>, %arg3: memref<16x32xf32, #tpu.memory_space<vmem>>) attributes {dimension_semantics = [#tpu.dimension_semantics<parallel>], iteration_bounds = array<i64: 1>, scalar_prefetch = 0 : i64, scratch_operands = 0 : i64, tpu.core_type = #tpu.core_type<tc>, window_params = [{transform_indices = @transform_0, window_bounds = array<i64: 16, 32>}, {pipeline_mode = #tpu.pipeline_mode<synchronous>, transform_indices = @transform_1, window_bounds = array<i64: 1, 32>}, {transform_indices = @transform_2, window_bounds = array<i64: 16, 32>}]} {
    %c0 = arith.constant 0 : index
    %c0_0 = arith.constant 0 : index
    %0 = vector.load %arg1[%c0, %c0_0] : memref<16x32xf32, #tpu.memory_space<vmem>>, vector<16x32xf32>
    %1 = arith.mulf %0, %0 : vector<16x32xf32>
    %cst = arith.constant dense<0.000000e+00> : vector<16xf32>
    %2 = vector.multi_reduction <add>, %1, %cst [1] : vector<16x32xf32> to vector<16xf32>
    %3 = vector.shape_cast %2 : vector<16xf32> to vector<16x1xf32>
    %cst_1 = arith.constant 3.125000e-02 : f32
    %4 = vector.broadcast %cst_1 : f32 to vector<16x1xf32>
    %5 = arith.mulf %3, %4 : vector<16x1xf32>
    %cst_2 = arith.constant 9.99999974E-6 : f32
    %6 = vector.broadcast %cst_2 : f32 to vector<16x1xf32>
    %7 = arith.addf %5, %6 : vector<16x1xf32>
    %8 = math.rsqrt %7 : vector<16x1xf32>
    %9 = vector.broadcast %8 : vector<16x1xf32> to vector<16x32xf32>
    %10 = arith.mulf %0, %9 : vector<16x32xf32>
    %c0_3 = arith.constant 0 : index
    %c0_4 = arith.constant 0 : index
    %11 = vector.load %arg2[%c0_3, %c0_4] : memref<1x32xf32, #tpu.memory_space<vmem>>, vector<1x32xf32>
    %12 = vector.broadcast %11 : vector<1x32xf32> to vector<16x32xf32>
    %13 = arith.mulf %10, %12 : vector<16x32xf32>
    %c0_5 = arith.constant 0 : index
    %c0_6 = arith.constant 0 : index
    %14 = vector.load %arg3[%c0_5, %c0_6] : memref<16x32xf32, #tpu.memory_space<vmem>>, vector<16x32xf32>
    tpu.vector_store %arg3[%c0_5, %c0_6], %13 {strides = array<i32>} : memref<16x32xf32, #tpu.memory_space<vmem>>, vector<16x32xf32>,
    return
  }
  func.func @transform_0(%arg0: i32) -> (i32, i32) {
    %c0_i32 = arith.constant 0 : i32
    %c0_i32_0 = arith.constant 0 : i32
    return %arg0, %c0_i32 : i32, i32
  }
  func.func @transform_1(%arg0: i32) -> (i32, i32) {
    %c0_i32 = arith.constant 0 : i32
    %c0_i32_0 = arith.constant 0 : i32
    %c0_i32_1 = arith.constant 0 : i32
    return %c0_i32, %c0_i32_0 : i32, i32
  }
  func.func @transform_2(%arg0: i32) -> (i32, i32) {
    %c0_i32 = arith.constant 0 : i32
    %c0_i32_0 = arith.constant 0 : i32
    return %arg0, %c0_i32 : i32, i32
  }
}

</mosaic_0001>

<bundles_post_ra>
// kernel: tpu_custom_call.1
= control target key start
LH: loop header
LB: loop body
LE: loop exit
PB: predicated region body
PF: predicated region fallthrough
CT: control target
= control target key end

     0   :  { %7 = vsyncpa [#allocation3], 0  ;;  %s234_s0 = inlined_call_operand.hbm [shape: f32[16,32], index: 0, kind: input, shape index: {}]   ;;  %s235_s1 = inlined_call_operand.hbm [shape: f32[1,32], index: 1, kind: input, shape index: {}]   ;;  %s236_s2 = inlined_call_operand.hbm [shape: f32[16,32], index: 2, kind: output, shape index: {}]  }
   0x1   :  { %8 = vsyncpa [#allocation6], 0 }
   0x2   :  { %9 = vsyncpa [#allocation4], 0  ;;  %s14_s11 = sshll.u32 %s234_s0, 4  ;;  %s195_s12 = smov [#allocation2]   ;;  %s15_s11 = int_to_ptr.hbm [resolvable:$true] %s14_s11 }
   0x3   :  { %s16_s13 = sshll.u32 %s195_s12, 4  ;;  %s28_s16 = sshll.u32 %s235_s1, 4  ;;  %s17_s13 = int_to_ptr.vmem [resolvable:$true] %s16_s13  ;;  %s29_s16 = int_to_ptr.hbm [resolvable:$true] %s28_s16 }
   0x4   :  { %s196_s17 = smov 128   ;;  %s197_s18 = smov 8  }
   0x5   :  { %22 = dma.hbm_to_vmem [thread:$0]  %s15_s11, 256, %s17_s13, [#allocation3], %s196_s17, %s196_s17, %s197_s18  }
   0x6   :  { %s198_s19 = smov [#allocation5]  }
   0x7   :  { %s30_s20 = sshll.u32 %s198_s19, 4  ;;  %s31_s20 = int_to_ptr.vmem [resolvable:$true] %s30_s20 }
   0x8   :  { %33 = dma.hbm_to_vmem [thread:$0]  %s29_s16, 16, %s31_s20, [#allocation6]  }
   0x9   :  { %189 = dma.done.wait [#allocation3], 256  }
   0xa   :  { %190 = vsyncadd [#allocation3], 4294967040 }
   0xb   :  { %191 = dma.done.wait [#allocation6], 16  }
   0xc   :  { %192 = vsyncadd [#allocation6], 4294967280  ;;  %v42_v0 = vld [vmem:[#allocation2] sm:$0xff]  ;;  %vm46_vm0 = vcmask 261120   ;;  %v43_v2 = vld [vmem:[#allocation2 + $0x8] sm:$0xff]  ;;  %s199_s0 = smov [#allocation7]  }
   0xd   :  { %v44_v1 = vmul.f32 %v42_v0, %v42_v0  ;;  %v45_v4 = vmul.f32 %v43_v2, %v43_v2  ;;  %v112_v20 = vld [vmem:[#allocation5] ss:$0 sm:$0xff]  ;;  %s91_s1 = sshll.u32 %s199_s0, 4  ;;  %s93_s23 = sshll.u32 %s236_s2, 4  ;;  %s92_s1 = int_to_ptr.vmem [resolvable:$true] %s91_s1  ;;  %s94_s23 = int_to_ptr.hbm [resolvable:$true] %s93_s23 }
   0xf   :  { %v47_v3 = vsel %vm46_vm0, %v44_v1, 0.0  ;;  %v50_v5 = vsel %vm46_vm0, %v45_v4, 0.0 }
  0x10   :  { %48 = vadd.xlane.f32.xlu0 %v47_v3 }
  0x18   :  { %51 = vadd.xlane.f32.xlu0 %v50_v5 }
  0x83   :  { %v49_v6 = vpop.xlane.xlu0 %48 }
  0x84   :  { %v53_v7 = vmul.f32 0.03125, %v49_v6 }
  0x86   :  { %v55_v8 = vadd.f32 1e-05, %v53_v7 }
  0x88   :  { %113 = vrsqrt.f32 %v55_v8  ;;  %vm63_vm2 = vweird.f32 %v55_v8 }
  0x8b   :  { %v52_v9 = vpop.xlane.xlu0 %51 }
  0x8c   :  { %v54_v10 = vmul.f32 0.03125, %v52_v9 }
  0x8e   :  { %v114_v11 = vpop.eup %113  ;;  %v56_v12 = vadd.f32 1e-05, %v54_v10 }
  0x8f   :  { %v58_v13 = vmul.f32 %v114_v11, %v55_v8  ;;  %vm64_vm1 = vweird.f32 %v114_v11 }
  0x90   :  { %115 = vrsqrt.f32 %v56_v12  ;;  %vm65_vm3 = vmor %vm63_vm2, %vm64_vm1  ;;  %vm73_vm5 = vweird.f32 %v56_v12 }
  0x91   :  { %v59_v14 = vmul.f32 %v114_v11, %v58_v13 }
  0x93   :  { %v60_v15 = vmul.f32 0.5, %v59_v14 }
  0x95   :  { %v61_v16 = vsub.f32 1.5, %v60_v15 }
  0x96   :  { %v116_v17 = vpop.eup %115 }
  0x97   :  { %v62_v18 = vmul.f32 %v114_v11, %v61_v16  ;;  %v68_v19 = vmul.f32 %v116_v17, %v56_v12  ;;  %vm74_vm4 = vweird.f32 %v116_v17 }
  0x98   :  { %vm75_vm6 = vmor %vm73_vm5, %vm74_vm4 }
  0x99   :  { %v66_v21 = vsel %vm65_vm3, %v114_v11, %v62_v18  ;;  %v69_v22 = vmul.f32 %v116_v17, %v68_v19 }
  0x9a   :  { %v77_v23 = vmul.f32 %v66_v21, %v42_v0 }
  0x9b   :  { %v70_v24 = vmul.f32 0.5, %v69_v22 }
  0x9c   :  { %v83_v25 = vmul.f32 %v112_v20, %v77_v23 }
  0x9d   :  { %v71_v26 = vsub.f32 1.5, %v70_v24 }
  0x9e   :  { %85 = vst.msk [vmem:[#allocation7] sm:$0xff] %vm46_vm0, %v83_v25 }
  0x9f   :  { %v72_v27 = vmul.f32 %v116_v17, %v71_v26 }
  0xa1   :  { %v76_v28 = vsel %vm75_vm6, %v116_v17, %v72_v27 }
  0xa2   :  { %v78_v29 = vmul.f32 %v76_v28, %v43_v2 }
  0xa4   :  { %v84_v30 = vmul.f32 %v112_v20, %v78_v29 }
  0xa6   :  { %86 = vst.msk [vmem:[#allocation7 + $0x8] sm:$0xff] %vm46_vm0, %v84_v30 }
  0xa7   :  { %99 = dma.vmem_to_hbm [thread:$0]  %s92_s1, 256, %s94_s23, [#allocation4], %s196_s17, %s196_s17, %s197_s18  }
  0xa8   :  { %193 = dma.done.wait [#allocation4], 256  }
  0xa9   :  { %194 = vsyncadd [#allocation4], 4294967040 }
  0xaa   :  { %104 = vsyncpa [#allocation3], 1 }
  0xab   :  { %105 = vsyncpa [#allocation6], 1 }
  0xac   :  { %106 = vsyncpa [#allocation4], 1 }

</bundles_post_ra>
